<compile_context>
chip_gen: v5e
topology: v5e:2x2
jax: 0.10.0
libtpu: 0.0.40
codegen_flags: <defaults>
</compile_context>

<pallas_src>
import numpy as np
import jax
import jax.numpy as jnp
from jax.experimental import pallas as pl
from jax.experimental.pallas import tpu as pltpu


_LANE = 128
_SUBLANE = 8
_MAX_T_TILE = 1024
_VMEM_TILE_BUDGET = 24 * 1024 * 1024    # data tiles (double buffered) + scratch
_VMEM_LIMIT = 40 * 1024 * 1024          # scoped VMEM limit (safe on all chips)


def _ceil_to(x, m):
    return -(-x // m) * m


def _tile_bytes(B, t_tile, M, mel_itemsize):
    """Rough VMEM footprint of one grid step (double-buffered inputs + scratch)."""
    m_pad = _ceil_to(M, _LANE)
    b_pad = _ceil_to(B, _SUBLANE)
    t_sub = _ceil_to(t_tile, _SUBLANE)
    t_lane = _ceil_to(t_tile, _LANE)
    mel_tiles = 3 * B * t_sub * m_pad * mel_itemsize       # mel_p, post_p, mel_t
    frm_tiles = 7 * b_pad * t_lane * 4                     # f0/uv/energy + mask
    scratch = 7 * b_pad * t_lane * 4                       # f32 accumulators
    return 2 * (mel_tiles + frm_tiles) + scratch


def _plan_time_tiling(B, T, M, mel_itemsize):
    """Return (T_pad, T_tile, n_tiles) for the mel-time axis."""
    def fits(t):
        return _tile_bytes(B, t, M, mel_itemsize) <= _VMEM_TILE_BUDGET

    if T <= _MAX_T_TILE and fits(T):
        return T, T, 1                        # single resident tile, no padding
    T_pad = _ceil_to(T, _LANE)
    for cand in range(min(_MAX_T_TILE, T_pad), _LANE - 1, -_LANE):
        if T_pad % cand == 0 and fits(cand):
            return T_pad, cand, T_pad // cand
    return T_pad, _LANE, T_pad // _LANE       # 128-frame tiles always fit


def _fs2_loss_kernel(mel_p_ref, post_p_ref, mel_t_ref,
                     f0_p_ref, uv_p_ref, f0_t_ref, uv_t_ref,
                     energy_p_ref, energy_t_ref, mel_mask_ref,
                     logdur_p_ref, dur_t_ref, src_mask_ref,
                     out_ref,
                     acc_mel, acc_post, acc_uv, acc_f0, acc_en,
                     acc_frames, acc_voiced):
    f32 = jnp.float32
    c = pl.program_id(0)        # core slice (parallel)
    t = pl.program_id(1)        # time tile (arbitrary / sequential)

    @pl.when(t == 0)
    def _init():
        for acc in (acc_mel, acc_post, acc_uv, acc_f0, acc_en,
                    acc_frames, acc_voiced):
            acc[...] = jnp.zeros_like(acc)

    mask = mel_mask_ref[...].astype(f32)          # (B, Tt), 1.0 = valid frame
    mel_t = mel_t_ref[...].astype(f32)

    # mel / postnet masked L1: reduce over the mel-channel (lane) axis per tile
    # and keep VPU-friendly (B, Tt) running partials; the final scalar
    # reduction happens once in the finalize step.
    acc_mel[...] += jnp.sum(jnp.abs(mel_p_ref[...].astype(f32) - mel_t), axis=-1) * mask
    acc_post[...] += jnp.sum(jnp.abs(post_p_ref[...].astype(f32) - mel_t), axis=-1) * mask

    # pitch (use_uv=True): BCE-with-logits on uv + voiced-only f0 MSE.
    x = uv_p_ref[...].astype(f32)
    y = uv_t_ref[...].astype(f32)
    bce = jnp.maximum(x, 0.0) - x * y + jnp.log1p(jnp.exp(-jnp.abs(x)))
    acc_uv[...] += bce * mask
    voiced = mask * (y == 0.0).astype(f32)
    f0_d = f0_p_ref[...].astype(f32) - f0_t_ref[...].astype(f32)
    acc_f0[...] += f0_d * f0_d * voiced

    # energy masked MSE (frame level).
    e_d = energy_p_ref[...].astype(f32) - energy_t_ref[...].astype(f32)
    acc_en[...] += e_d * e_d * mask

    acc_frames[...] += mask
    acc_voiced[...] += voiced

    @pl.when(t == pl.num_programs(1) - 1)
    def _finalize():
        mel_num = jnp.sum(acc_mel[...])
        post_num = jnp.sum(acc_post[...])
        uv_num = jnp.sum(acc_uv[...])
        f0_num = jnp.sum(acc_f0[...])
        en_num = jnp.sum(acc_en[...])
        frames = jnp.sum(acc_frames[...])
        voiced_cnt = jnp.sum(acc_voiced[...])

        # Duration loss partials: tiny token-level (B, T_src) tensors kept
        # resident (same block every step -> no re-DMA).  Only the first core
        # slice contributes so a megacore split does not double-count them.
        core0 = (c == 0).astype(f32)
        src_m = src_mask_ref[...].astype(f32)
        d_d = logdur_p_ref[...].astype(f32) - jnp.log(dur_t_ref[...].astype(f32) + 1.0)
        dur_num = core0 * jnp.sum(d_d * d_d * src_m)
        dur_cnt = core0 * jnp.sum(src_m)

        vals = (mel_num, post_num, uv_num, f0_num, en_num,
                frames, voiced_cnt, dur_num, dur_cnt)
        lane = jax.lax.broadcasted_iota(jnp.int32, (1, 1, 16), 2)
        row = jnp.zeros((1, 1, 16), f32)
        for i, v in enumerate(vals):
            row = jnp.where(lane == i, v, row)
        out_ref[...] = row


def _fused_loss_sums(mel_p, post_p, mel_t, f0_p, uv_p, f0_t, uv_t,
                     energy_p, energy_t, mel_mask_f, logdur_p, dur_t, src_mask_f):
    """Run the fused kernel and return the 16 global partial sums / counts."""
    B, T, M = mel_p.shape
    T_src = logdur_p.shape[1]
    mel_itemsize = max(mel_p.dtype.itemsize, post_p.dtype.itemsize,
                       mel_t.dtype.itemsize)
    T_pad, T_tile, n_tiles = _plan_time_tiling(B, T, M, mel_itemsize)

    def pad_t(x):
        if x.shape[1] == T_pad:
            return x
        pads = ((0, 0), (0, T_pad - x.shape[1])) + ((0, 0),) * (x.ndim - 2)
        return jnp.pad(x, pads)

    if T_pad != T:
        mel_p, post_p = pad_t(mel_p), pad_t(post_p)
        f0_p, uv_p, f0_t, uv_t = map(pad_t, (f0_p, uv_p, f0_t, uv_t))
        energy_p, energy_t, mel_mask_f = map(pad_t, (energy_p, energy_t, mel_mask_f))

    # mel_targets may be longer than the mel mask (the module crops it).  Express
    # the crop through the BlockSpec window instead of an HBM->HBM slice whenever
    # the (8,128) tiling constraints allow it.
    T_tgt = mel_t.shape[1]
    window_ok = (T_tgt >= T_pad) and (T_tile % _SUBLANE == 0 or T_tgt == T_pad)
    if not window_ok:
        mel_t = mel_t[:, :T_pad, :] if T_tgt >= T_pad else pad_t(mel_t)

    n_cores = 2 if (n_tiles >= 2 and n_tiles % 2 == 0) else 1
    per_core = n_tiles // n_cores

    spec3 = pl.BlockSpec((B, T_tile, M), lambda c, t: (0, c * per_core + t, 0))
    spec2 = pl.BlockSpec((B, T_tile), lambda c, t: (0, c * per_core + t))
    spec_src = pl.BlockSpec((B, T_src), lambda c, t: (0, 0))
    out_spec = pl.BlockSpec((1, 1, 16), lambda c, t: (c, 0, 0))

    in_specs = [spec3, spec3, spec3,
                spec2, spec2, spec2, spec2, spec2, spec2, spec2,
                spec_src, spec_src, spec_src]

    inputs = (mel_p, post_p, mel_t, f0_p, uv_p, f0_t, uv_t,
              energy_p, energy_t, mel_mask_f, logdur_p, dur_t, src_mask_f)

    bytes_accessed = int(sum(int(np.prod(x.shape)) * x.dtype.itemsize
                             for x in inputs)) + n_cores * 16 * 4
    flops = int(4 * 3 * B * T_pad * M + 40 * B * T_pad + 12 * B * T_src)
    transcendentals = int(2 * B * T_pad)

    partials = pl.pallas_call(
        _fs2_loss_kernel,
        out_shape=jax.ShapeDtypeStruct((n_cores, 1, 16), jnp.float32),
        grid_spec=pltpu.PrefetchScalarGridSpec(
            num_scalar_prefetch=0,
            grid=(n_cores, per_core),
            in_specs=in_specs,
            out_specs=out_spec,
            scratch_shapes=[pltpu.VMEM((B, T_tile), jnp.float32)
                            for _ in range(7)],
        ),
        compiler_params=pltpu.CompilerParams(
            dimension_semantics=("parallel", "arbitrary"),
            vmem_limit_bytes=_VMEM_LIMIT,
        ),
        cost_estimate=pl.CostEstimate(flops=flops,
                                      transcendentals=transcendentals,
                                      bytes_accessed=bytes_accessed),
    )(*inputs)
    return jnp.sum(partials, axis=(0, 1))   # (16,) global sums / counts


def supervised_fastspeech2_loss(model_output, targets, step=0, *,
                                pitch_feature_level="frame_level",
                                energy_feature_level="frame_level",
                                use_uv=True):
    """Mirrors SupervisedFastSpeech2Loss.forward for the configuration
    (pitch_feature_level='frame_level', energy_feature_level='frame_level',
     use_uv=True)."""
    # TODO(synk): use_uv=False / phoneme-level pitch & energy branches (plain
    # masked MSE with src-level masks) are not wired into the fused kernel.
    assert use_uv and pitch_feature_level == "frame_level" \
        and energy_feature_level == "frame_level"

    (mel_predictions, postnet_mel_predictions, log_duration_predictions, _,
     pitch_predictions, energy_predictions, src_masks, mel_masks) = model_output
    mel_targets, duration_targets, pitch_targets, energy_targets = targets

    # PyTorch forward: masks arrive as padding masks (True = pad) and get inverted.
    src_valid = jnp.logical_not(src_masks).astype(jnp.float32)
    mel_valid = jnp.logical_not(mel_masks).astype(jnp.float32)

    M = mel_predictions.shape[-1]
    f0_pred = pitch_predictions[..., 0]
    uv_pred = pitch_predictions[..., 1]

    sums = _fused_loss_sums(
        mel_predictions, postnet_mel_predictions, mel_targets,
        f0_pred, uv_pred, pitch_targets["f0"], pitch_targets["uv"],
        energy_predictions, energy_targets, mel_valid,
        log_duration_predictions, duration_targets, src_valid)

    (mel_num, post_num, uv_num, f0_num, en_num,
     frames, voiced_cnt, dur_num, dur_cnt) = (sums[i] for i in range(9))

    # Degenerate (all padded / no voiced frames) cases give 0 instead of NaN;
    # numerator is also 0 there, otherwise identical to the PyTorch reference.
    def _div(num, den):
        return num / jnp.maximum(den, 1.0)

    mel_loss = {"mel": _div(mel_num, frames * M),
                "postnet": _div(post_num, frames * M)}
    duration_loss = {"dur": _div(dur_num, dur_cnt)}
    pitch_loss = {"uv": _div(uv_num, frames), "f0": _div(f0_num, voiced_cnt)}
    energy_loss = {"energy": _div(en_num, frames)}
    return mel_loss, duration_loss, pitch_loss, energy_loss


# ----------------------------- pure-JAX reference -----------------------------
def _reference(model_output, targets):
    (mel_p, post_p, logdur_p, _, pitch_p, energy_p, src_m, mel_m) = model_output
    mel_t, dur_t, pitch_t, energy_t = targets
    src_v = (~src_m).astype(jnp.float32)
    mel_v = (~mel_m).astype(jnp.float32)
    mel_t = mel_t[:, :mel_m.shape[1], :].astype(jnp.float32)
    mel_p = mel_p.astype(jnp.float32)
    post_p = post_p.astype(jnp.float32)

    m3 = mel_v[:, :, None]
    n_mel = jnp.sum(mel_v) * mel_t.shape[-1]
    mel = jnp.sum(jnp.abs(mel_p - mel_t) * m3) / n_mel
    post = jnp.sum(jnp.abs(post_p - mel_t) * m3) / n_mel

    ldt = jnp.log(dur_t.astype(jnp.float32) + 1.0)
    dur = jnp.sum(((logdur_p - ldt) ** 2) * src_v) / jnp.sum(src_v)

    x = pitch_p[..., 1].astype(jnp.float32)
    y = pitch_t["uv"].astype(jnp.float32)
    bce = jnp.maximum(x, 0.0) - x * y + jnp.log1p(jnp.exp(-jnp.abs(x)))
    uv = jnp.sum(bce * mel_v) / jnp.sum(mel_v)
    npad = mel_v * (y == 0.0).astype(jnp.float32)
    f0 = jnp.sum(((pitch_p[..., 0] - pitch_t["f0"]) ** 2) * npad) / jnp.sum(npad)

    energy = jnp.sum(((energy_p - energy_t) ** 2) * mel_v) / jnp.sum(mel_v)
    return mel, post, dur, uv, f0, energy


if __name__ == "__main__":
    def make_inputs(key, B, T_src, T_mel, M, T_mel_tgt):
        ks = jax.random.split(key, 12)
        mel_pred = jax.random.normal(ks[0], (B, T_mel, M), jnp.float32)
        post_pred = jax.random.normal(ks[1], (B, T_mel, M), jnp.float32)
        mel_tgt = jax.random.normal(ks[2], (B, T_mel_tgt, M), jnp.float32)
        logdur_pred = jax.random.normal(ks[3], (B, T_src), jnp.float32)
        dur_tgt = jax.random.randint(ks[4], (B, T_src), 1, 6).astype(jnp.float32)
        pitch_pred = jax.random.normal(ks[5], (B, T_mel, 2), jnp.float32)
        f0_tgt = jax.random.normal(ks[6], (B, T_mel), jnp.float32)
        uv_tgt = (jax.random.uniform(ks[7], (B, T_mel)) > 0.5).astype(jnp.float32)
        energy_pred = jax.random.normal(ks[8], (B, T_mel), jnp.float32)
        energy_tgt = jax.random.normal(ks[9], (B, T_mel), jnp.float32)
        src_len = jnp.concatenate(
            [jnp.array([T_src]),
             jax.random.randint(ks[10], (B - 1,), max(1, T_src // 2), T_src + 1)])
        mel_len = jnp.concatenate(
            [jnp.array([T_mel]),
             jax.random.randint(ks[11], (B - 1,), max(1, T_mel // 2), T_mel + 1)])
        src_masks = jnp.arange(T_src)[None, :] >= src_len[:, None]   # True = pad
        mel_masks = jnp.arange(T_mel)[None, :] >= mel_len[:, None]
        model_output = (mel_pred, post_pred, logdur_pred, None, pitch_pred,
                        energy_pred, src_masks, mel_masks)
        targets = (mel_tgt, dur_tgt, {"f0": f0_tgt, "uv": uv_tgt}, energy_tgt)
        return model_output, targets

    cases = {
        # (B, T_src, T_mel, M, T_mel_targets)
        "small_single_tile": (2, 8, 16, 8, 20),
        "tiled_two_core_split": (2, 12, 1280, 8, 1288),
    }
    for name, (B, T_src, T_mel, M, T_tgt) in cases.items():
        mo, tg = make_inputs(jax.random.PRNGKey(0), B, T_src, T_mel, M, T_tgt)
        mel_loss, duration_loss, pitch_loss, energy_loss = \
            supervised_fastspeech2_loss(mo, tg, step=0)
        flat = [mel_loss["mel"], mel_loss["postnet"], duration_loss["dur"],
                pitch_loss["uv"], pitch_loss["f0"], energy_loss["energy"]]
        jax.block_until_ready(flat)

        ref = _reference(mo, tg)
        np.testing.assert_allclose(
            np.array([float(v) for v in flat]),
            np.array([float(v) for v in ref]),
            rtol=1e-5, atol=1e-5, err_msg=name)

    print("KERNEL_OK")
</pallas_src>

<mosaic_0001>
module attributes {stable_mosaic.version = 11 : i64} {
  func.func @_fs2_loss_kernel(%arg0: i32, %arg1: i32, %arg2: memref<2x16x8xf32, #tpu.memory_space<vmem>>, %arg3: memref<2x16x8xf32, #tpu.memory_space<vmem>>, %arg4: memref<2x16x8xf32, #tpu.memory_space<vmem>>, %arg5: memref<2x16xf32, #tpu.memory_space<vmem>>, %arg6: memref<2x16xf32, #tpu.memory_space<vmem>>, %arg7: memref<2x16xf32, #tpu.memory_space<vmem>>, %arg8: memref<2x16xf32, #tpu.memory_space<vmem>>, %arg9: memref<2x16xf32, #tpu.memory_space<vmem>>, %arg10: memref<2x16xf32, #tpu.memory_space<vmem>>, %arg11: memref<2x16xf32, #tpu.memory_space<vmem>>, %arg12: memref<2x8xf32, #tpu.memory_space<vmem>>, %arg13: memref<2x8xf32, #tpu.memory_space<vmem>>, %arg14: memref<2x8xf32, #tpu.memory_space<vmem>>, %arg15: memref<1x1x16xf32, #tpu.memory_space<vmem>>, %arg16: memref<2x16xf32, #tpu.memory_space<vmem>>, %arg17: memref<2x16xf32, #tpu.memory_space<vmem>>, %arg18: memref<2x16xf32, #tpu.memory_space<vmem>>, %arg19: memref<2x16xf32, #tpu.memory_space<vmem>>, %arg20: memref<2x16xf32, #tpu.memory_space<vmem>>, %arg21: memref<2x16xf32, #tpu.memory_space<vmem>>, %arg22: memref<2x16xf32, #tpu.memory_space<vmem>>) attributes {dimension_semantics = [#tpu.dimension_semantics<parallel>, #tpu.dimension_semantics<arbitrary>], iteration_bounds = array<i64: 1, 1>, scalar_prefetch = 0 : i64, scratch_operands = 7 : i64, tpu.core_type = #tpu.core_type<tc>, window_params = [{transform_indices = @transform_0, window_bounds = array<i64: 2, 16, 8>}, {transform_indices = @transform_1, window_bounds = array<i64: 2, 16, 8>}, {transform_indices = @transform_2, window_bounds = array<i64: 2, 16, 8>}, {transform_indices = @transform_3, window_bounds = array<i64: 2, 16>}, {transform_indices = @transform_4, window_bounds = array<i64: 2, 16>}, {transform_indices = @transform_5, window_bounds = array<i64: 2, 16>}, {transform_indices = @transform_6, window_bounds = array<i64: 2, 16>}, {transform_indices = @transform_7, window_bounds = array<i64: 2, 16>}, {transform_indices = @transform_8, window_bounds = array<i64: 2, 16>}, {transform_indices = @transform_9, window_bounds = array<i64: 2, 16>}, {pipeline_mode = #tpu.pipeline_mode<synchronous>, transform_indices = @transform_10, window_bounds = array<i64: 2, 8>}, {pipeline_mode = #tpu.pipeline_mode<synchronous>, transform_indices = @transform_11, window_bounds = array<i64: 2, 8>}, {pipeline_mode = #tpu.pipeline_mode<synchronous>, transform_indices = @transform_12, window_bounds = array<i64: 2, 8>}, {transform_indices = @transform_13, window_bounds = array<i64: 1, 1, 16>}]} {
    %c0_i32 = arith.constant 0 : i32
    %0 = arith.cmpi eq, %arg1, %c0_i32 : i32
    %1 = arith.extui %0 : i1 to i32
    %c0_i32_0 = arith.constant 0 : i32
    %2 = arith.cmpi ne, %1, %c0_i32_0 : i32
    scf.if %2 {
      %cst_57 = arith.constant 0.000000e+00 : f32
      %67 = vector.broadcast %cst_57 : f32 to vector<2x16xf32>
      %c0_58 = arith.constant 0 : index
      %c0_59 = arith.constant 0 : index
      %68 = vector.load %arg16[%c0_58, %c0_59] : memref<2x16xf32, #tpu.memory_space<vmem>>, vector<2x16xf32>
      tpu.vector_store %arg16[%c0_58, %c0_59], %67 {strides = array<i32>} : memref<2x16xf32, #tpu.memory_space<vmem>>, vector<2x16xf32>,
      %cst_60 = arith.constant 0.000000e+00 : f32
      %69 = vector.broadcast %cst_60 : f32 to vector<2x16xf32>
      %c0_61 = arith.constant 0 : index
      %c0_62 = arith.constant 0 : index
      %70 = vector.load %arg17[%c0_61, %c0_62] : memref<2x16xf32, #tpu.memory_space<vmem>>, vector<2x16xf32>
      tpu.vector_store %arg17[%c0_61, %c0_62], %69 {strides = array<i32>} : memref<2x16xf32, #tpu.memory_space<vmem>>, vector<2x16xf32>,
      %cst_63 = arith.constant 0.000000e+00 : f32
      %71 = vector.broadcast %cst_63 : f32 to vector<2x16xf32>
      %c0_64 = arith.constant 0 : index
      %c0_65 = arith.constant 0 : index
      %72 = vector.load %arg18[%c0_64, %c0_65] : memref<2x16xf32, #tpu.memory_space<vmem>>, vector<2x16xf32>
      tpu.vector_store %arg18[%c0_64, %c0_65], %71 {strides = array<i32>} : memref<2x16xf32, #tpu.memory_space<vmem>>, vector<2x16xf32>,
      %cst_66 = arith.constant 0.000000e+00 : f32
      %73 = vector.broadcast %cst_66 : f32 to vector<2x16xf32>
      %c0_67 = arith.constant 0 : index
      %c0_68 = arith.constant 0 : index
      %74 = vector.load %arg19[%c0_67, %c0_68] : memref<2x16xf32, #tpu.memory_space<vmem>>, vector<2x16xf32>
      tpu.vector_store %arg19[%c0_67, %c0_68], %73 {strides = array<i32>} : memref<2x16xf32, #tpu.memory_space<vmem>>, vector<2x16xf32>,
      %cst_69 = arith.constant 0.000000e+00 : f32
      %75 = vector.broadcast %cst_69 : f32 to vector<2x16xf32>
      %c0_70 = arith.constant 0 : index
      %c0_71 = arith.constant 0 : index
      %76 = vector.load %arg20[%c0_70, %c0_71] : memref<2x16xf32, #tpu.memory_space<vmem>>, vector<2x16xf32>
      tpu.vector_store %arg20[%c0_70, %c0_71], %75 {strides = array<i32>} : memref<2x16xf32, #tpu.memory_space<vmem>>, vector<2x16xf32>,
      %cst_72 = arith.constant 0.000000e+00 : f32
      %77 = vector.broadcast %cst_72 : f32 to vector<2x16xf32>
      %c0_73 = arith.constant 0 : index
      %c0_74 = arith.constant 0 : index
      %78 = vector.load %arg21[%c0_73, %c0_74] : memref<2x16xf32, #tpu.memory_space<vmem>>, vector<2x16xf32>
      tpu.vector_store %arg21[%c0_73, %c0_74], %77 {strides = array<i32>} : memref<2x16xf32, #tpu.memory_space<vmem>>, vector<2x16xf32>,
      %cst_75 = arith.constant 0.000000e+00 : f32
      %79 = vector.broadcast %cst_75 : f32 to vector<2x16xf32>
      %c0_76 = arith.constant 0 : index
      %c0_77 = arith.constant 0 : index
      %80 = vector.load %arg22[%c0_76, %c0_77] : memref<2x16xf32, #tpu.memory_space<vmem>>, vector<2x16xf32>
      tpu.vector_store %arg22[%c0_76, %c0_77], %79 {strides = array<i32>} : memref<2x16xf32, #tpu.memory_space<vmem>>, vector<2x16xf32>,
    } else {
    }
    %c0 = arith.constant 0 : index
    %c0_1 = arith.constant 0 : index
    %3 = vector.load %arg11[%c0, %c0_1] : memref<2x16xf32, #tpu.memory_space<vmem>>, vector<2x16xf32>
    %c0_2 = arith.constant 0 : index
    %c0_3 = arith.constant 0 : index
    %c0_4 = arith.constant 0 : index
    %4 = vector.load %arg4[%c0_2, %c0_3, %c0_4] : memref<2x16x8xf32, #tpu.memory_space<vmem>>, vector<2x16x8xf32>
    %c0_5 = arith.constant 0 : index
    %c0_6 = arith.constant 0 : index
    %5 = vector.load %arg16[%c0_5, %c0_6] : memref<2x16xf32, #tpu.memory_space<vmem>>, vector<2x16xf32>
    %c0_7 = arith.constant 0 : index
    %c0_8 = arith.constant 0 : index
    %c0_9 = arith.constant 0 : index
    %6 = vector.load %arg2[%c0_7, %c0_8, %c0_9] : memref<2x16x8xf32, #tpu.memory_space<vmem>>, vector<2x16x8xf32>
    %7 = arith.subf %6, %4 : vector<2x16x8xf32>
    %8 = math.absf %7 : vector<2x16x8xf32>
    %cst = arith.constant dense<0.000000e+00> : vector<2x16xf32>
    %9 = vector.multi_reduction <add>, %8, %cst [2] : vector<2x16x8xf32> to vector<2x16xf32>
    %10 = arith.mulf %9, %3 : vector<2x16xf32>
    %11 = arith.addf %5, %10 : vector<2x16xf32>
    %c0_10 = arith.constant 0 : index
    %c0_11 = arith.constant 0 : index
    %12 = vector.load %arg16[%c0_10, %c0_11] : memref<2x16xf32, #tpu.memory_space<vmem>>, vector<2x16xf32>
    tpu.vector_store %arg16[%c0_10, %c0_11], %11 {strides = array<i32>} : memref<2x16xf32, #tpu.memory_space<vmem>>, vector<2x16xf32>,
    %c0_12 = arith.constant 0 : index
    %c0_13 = arith.constant 0 : index
    %13 = vector.load %arg17[%c0_12, %c0_13] : memref<2x16xf32, #tpu.memory_space<vmem>>, vector<2x16xf32>
    %c0_14 = arith.constant 0 : index
    %c0_15 = arith.constant 0 : index
    %c0_16 = arith.constant 0 : index
    %14 = vector.load %arg3[%c0_14, %c0_15, %c0_16] : memref<2x16x8xf32, #tpu.memory_space<vmem>>, vector<2x16x8xf32>
    %15 = arith.subf %14, %4 : vector<2x16x8xf32>
    %16 = math.absf %15 : vector<2x16x8xf32>
    %cst_17 = arith.constant dense<0.000000e+00> : vector<2x16xf32>
    %17 = vector.multi_reduction <add>, %16, %cst_17 [2] : vector<2x16x8xf32> to vector<2x16xf32>
    %18 = arith.mulf %17, %3 : vector<2x16xf32>
    %19 = arith.addf %13, %18 : vector<2x16xf32>
    %c0_18 = arith.constant 0 : index
    %c0_19 = arith.constant 0 : index
    %20 = vector.load %arg17[%c0_18, %c0_19] : memref<2x16xf32, #tpu.memory_space<vmem>>, vector<2x16xf32>
    tpu.vector_store %arg17[%c0_18, %c0_19], %19 {strides = array<i32>} : memref<2x16xf32, #tpu.memory_space<vmem>>, vector<2x16xf32>,
    %c0_20 = arith.constant 0 : index
    %c0_21 = arith.constant 0 : index
    %21 = vector.load %arg6[%c0_20, %c0_21] : memref<2x16xf32, #tpu.memory_space<vmem>>, vector<2x16xf32>
    %c0_22 = arith.constant 0 : index
    %c0_23 = arith.constant 0 : index
    %22 = vector.load %arg8[%c0_22, %c0_23] : memref<2x16xf32, #tpu.memory_space<vmem>>, vector<2x16xf32>
    %cst_24 = arith.constant 0.000000e+00 : f32
    %23 = vector.broadcast %cst_24 : f32 to vector<2x16xf32>
    %24 = arith.maximumf %21, %23 : vector<2x16xf32>
    %25 = arith.mulf %21, %22 : vector<2x16xf32>
    %26 = arith.subf %24, %25 : vector<2x16xf32>
    %27 = math.absf %21 : vector<2x16xf32>
    %cst_25 = arith.constant 0.000000e+00 : f32
    %28 = vector.broadcast %cst_25 : f32 to vector<2x16xf32>
    %29 = arith.subf %28, %27 : vector<2x16xf32>
    %30 = math.exp %29 : vector<2x16xf32>
    %31 = math.log1p %30 : vector<2x16xf32>
    %32 = arith.addf %26, %31 : vector<2x16xf32>
    %c0_26 = arith.constant 0 : index
    %c0_27 = arith.constant 0 : index
    %33 = vector.load %arg18[%c0_26, %c0_27] : memref<2x16xf32, #tpu.memory_space<vmem>>, vector<2x16xf32>
    %34 = arith.mulf %32, %3 : vector<2x16xf32>
    %35 = arith.addf %33, %34 : vector<2x16xf32>
    %c0_28 = arith.constant 0 : index
    %c0_29 = arith.constant 0 : index
    %36 = vector.load %arg18[%c0_28, %c0_29] : memref<2x16xf32, #tpu.memory_space<vmem>>, vector<2x16xf32>
    tpu.vector_store %arg18[%c0_28, %c0_29], %35 {strides = array<i32>} : memref<2x16xf32, #tpu.memory_space<vmem>>, vector<2x16xf32>,
    %cst_30 = arith.constant 0.000000e+00 : f32
    %37 = vector.broadcast %cst_30 : f32 to vector<2x16xf32>
    %38 = arith.cmpf oeq, %22, %37 : vector<2x16xf32>
    %39 = arith.extui %38 : vector<2x16xi1> to vector<2x16xi32>
    %40 = arith.sitofp %39 : vector<2x16xi32> to vector<2x16xf32>
    %41 = arith.mulf %3, %40 : vector<2x16xf32>
    %c0_31 = arith.constant 0 : index
    %c0_32 = arith.constant 0 : index
    %42 = vector.load %arg5[%c0_31, %c0_32] : memref<2x16xf32, #tpu.memory_space<vmem>>, vector<2x16xf32>
    %c0_33 = arith.constant 0 : index
    %c0_34 = arith.constant 0 : index
    %43 = vector.load %arg7[%c0_33, %c0_34] : memref<2x16xf32, #tpu.memory_space<vmem>>, vector<2x16xf32>
    %44 = arith.subf %42, %43 : vector<2x16xf32>
    %c0_35 = arith.constant 0 : index
    %c0_36 = arith.constant 0 : index
    %45 = vector.load %arg19[%c0_35, %c0_36] : memref<2x16xf32, #tpu.memory_space<vmem>>, vector<2x16xf32>
    %46 = arith.mulf %44, %44 : vector<2x16xf32>
    %47 = arith.mulf %46, %41 : vector<2x16xf32>
    %48 = arith.addf %45, %47 : vector<2x16xf32>
    %c0_37 = arith.constant 0 : index
    %c0_38 = arith.constant 0 : index
    %49 = vector.load %arg19[%c0_37, %c0_38] : memref<2x16xf32, #tpu.memory_space<vmem>>, vector<2x16xf32>
    tpu.vector_store %arg19[%c0_37, %c0_38], %48 {strides = array<i32>} : memref<2x16xf32, #tpu.memory_space<vmem>>, vector<2x16xf32>,
    %c0_39 = arith.constant 0 : index
    %c0_40 = arith.constant 0 : index
    %50 = vector.load %arg9[%c0_39, %c0_40] : memref<2x16xf32, #tpu.memory_space<vmem>>, vector<2x16xf32>
    %c0_41 = arith.constant 0 : index
    %c0_42 = arith.constant 0 : index
    %51 = vector.load %arg10[%c0_41, %c0_42] : memref<2x16xf32, #tpu.memory_space<vmem>>, vector<2x16xf32>
    %52 = arith.subf %50, %51 : vector<2x16xf32>
    %c0_43 = arith.constant 0 : index
    %c0_44 = arith.constant 0 : index
    %53 = vector.load %arg20[%c0_43, %c0_44] : memref<2x16xf32, #tpu.memory_space<vmem>>, vector<2x16xf32>
    %54 = arith.mulf %52, %52 : vector<2x16xf32>
    %55 = arith.mulf %54, %3 : vector<2x16xf32>
    %56 = arith.addf %53, %55 : vector<2x16xf32>
    %c0_45 = arith.constant 0 : index
    %c0_46 = arith.constant 0 : index
    %57 = vector.load %arg20[%c0_45, %c0_46] : memref<2x16xf32, #tpu.memory_space<vmem>>, vector<2x16xf32>
    tpu.vector_store %arg20[%c0_45, %c0_46], %56 {strides = array<i32>} : memref<2x16xf32, #tpu.memory_space<vmem>>, vector<2x16xf32>,
    %c0_47 = arith.constant 0 : index
    %c0_48 = arith.constant 0 : index
    %58 = vector.load %arg21[%c0_47, %c0_48] : memref<2x16xf32, #tpu.memory_space<vmem>>, vector<2x16xf32>
    %59 = arith.addf %58, %3 : vector<2x16xf32>
    %c0_49 = arith.constant 0 : index
    %c0_50 = arith.constant 0 : index
    %60 = vector.load %arg21[%c0_49, %c0_50] : memref<2x16xf32, #tpu.memory_space<vmem>>, vector<2x16xf32>
    tpu.vector_store %arg21[%c0_49, %c0_50], %59 {strides = array<i32>} : memref<2x16xf32, #tpu.memory_space<vmem>>, vector<2x16xf32>,
    %c0_51 = arith.constant 0 : index
    %c0_52 = arith.constant 0 : index
    %61 = vector.load %arg22[%c0_51, %c0_52] : memref<2x16xf32, #tpu.memory_space<vmem>>, vector<2x16xf32>
    %62 = arith.addf %61, %41 : vector<2x16xf32>
    %c0_53 = arith.constant 0 : index
    %c0_54 = arith.constant 0 : index
    %63 = vector.load %arg22[%c0_53, %c0_54] : memref<2x16xf32, #tpu.memory_space<vmem>>, vector<2x16xf32>
    tpu.vector_store %arg22[%c0_53, %c0_54], %62 {strides = array<i32>} : memref<2x16xf32, #tpu.memory_space<vmem>>, vector<2x16xf32>,
    %c0_i32_55 = arith.constant 0 : i32
    %64 = arith.cmpi eq, %arg1, %c0_i32_55 : i32
    %65 = arith.extui %64 : i1 to i32
    %c0_i32_56 = arith.constant 0 : i32
    %66 = arith.cmpi ne, %65, %c0_i32_56 : i32
    scf.if %66 {
      %c0_57 = arith.constant 0 : index
      %c0_58 = arith.constant 0 : index
      %67 = vector.load %arg16[%c0_57, %c0_58] : memref<2x16xf32, #tpu.memory_space<vmem>>, vector<2x16xf32>
      %68 = vector.shape_cast %67 : vector<2x16xf32> to vector<1x2x16xf32>
      %cst_59 = arith.constant dense<0.000000e+00> : vector<1xf32>
      %69 = vector.multi_reduction <add>, %68, %cst_59 [1, 2] : vector<1x2x16xf32> to vector<1xf32>
      %70 = vector.shape_cast %69 : vector<1xf32> to vector<1x1x1xf32>
      %71 = vector.extract %70[0, 0, 0] : f32 from vector<1x1x1xf32>
      %c0_60 = arith.constant 0 : index
      %c0_61 = arith.constant 0 : index
      %72 = vector.load %arg17[%c0_60, %c0_61] : memref<2x16xf32, #tpu.memory_space<vmem>>, vector<2x16xf32>
      %73 = vector.shape_cast %72 : vector<2x16xf32> to vector<1x2x16xf32>
      %cst_62 = arith.constant dense<0.000000e+00> : vector<1xf32>
      %74 = vector.multi_reduction <add>, %73, %cst_62 [1, 2] : vector<1x2x16xf32> to vector<1xf32>
      %75 = vector.shape_cast %74 : vector<1xf32> to vector<1x1x1xf32>
      %76 = vector.extract %75[0, 0, 0] : f32 from vector<1x1x1xf32>
      %c0_63 = arith.constant 0 : index
      %c0_64 = arith.constant 0 : index
      %77 = vector.load %arg18[%c0_63, %c0_64] : memref<2x16xf32, #tpu.memory_space<vmem>>, vector<2x16xf32>
      %78 = vector.shape_cast %77 : vector<2x16xf32> to vector<1x2x16xf32>
      %cst_65 = arith.constant dense<0.000000e+00> : vector<1xf32>
      %79 = vector.multi_reduction <add>, %78, %cst_65 [1, 2] : vector<1x2x16xf32> to vector<1xf32>
      %80 = vector.shape_cast %79 : vector<1xf32> to vector<1x1x1xf32>
      %81 = vector.extract %80[0, 0, 0] : f32 from vector<1x1x1xf32>
      %c0_66 = arith.constant 0 : index
      %c0_67 = arith.constant 0 : index
      %82 = vector.load %arg19[%c0_66, %c0_67] : memref<2x16xf32, #tpu.memory_space<vmem>>, vector<2x16xf32>
      %83 = vector.shape_cast %82 : vector<2x16xf32> to vector<1x2x16xf32>
      %cst_68 = arith.constant dense<0.000000e+00> : vector<1xf32>
      %84 = vector.multi_reduction <add>, %83, %cst_68 [1, 2] : vector<1x2x16xf32> to vector<1xf32>
      %85 = vector.shape_cast %84 : vector<1xf32> to vector<1x1x1xf32>
      %86 = vector.extract %85[0, 0, 0] : f32 from vector<1x1x1xf32>
      %c0_69 = arith.constant 0 : index
      %c0_70 = arith.constant 0 : index
      %87 = vector.load %arg20[%c0_69, %c0_70] : memref<2x16xf32, #tpu.memory_space<vmem>>, vector<2x16xf32>
      %88 = vector.shape_cast %87 : vector<2x16xf32> to vector<1x2x16xf32>
      %cst_71 = arith.constant dense<0.000000e+00> : vector<1xf32>
      %89 = vector.multi_reduction <add>, %88, %cst_71 [1, 2] : vector<1x2x16xf32> to vector<1xf32>
      %90 = vector.shape_cast %89 : vector<1xf32> to vector<1x1x1xf32>
      %91 = vector.extract %90[0, 0, 0] : f32 from vector<1x1x1xf32>
      %c0_72 = arith.constant 0 : index
      %c0_73 = arith.constant 0 : index
      %92 = vector.load %arg21[%c0_72, %c0_73] : memref<2x16xf32, #tpu.memory_space<vmem>>, vector<2x16xf32>
      %93 = vector.shape_cast %92 : vector<2x16xf32> to vector<1x2x16xf32>
      %cst_74 = arith.constant dense<0.000000e+00> : vector<1xf32>
      %94 = vector.multi_reduction <add>, %93, %cst_74 [1, 2] : vector<1x2x16xf32> to vector<1xf32>
      %95 = vector.shape_cast %94 : vector<1xf32> to vector<1x1x1xf32>
      %96 = vector.extract %95[0, 0, 0] : f32 from vector<1x1x1xf32>
      %c0_75 = arith.constant 0 : index
      %c0_76 = arith.constant 0 : index
      %97 = vector.load %arg22[%c0_75, %c0_76] : memref<2x16xf32, #tpu.memory_space<vmem>>, vector<2x16xf32>
      %98 = vector.shape_cast %97 : vector<2x16xf32> to vector<1x2x16xf32>
      %cst_77 = arith.constant dense<0.000000e+00> : vector<1xf32>
      %99 = vector.multi_reduction <add>, %98, %cst_77 [1, 2] : vector<1x2x16xf32> to vector<1xf32>
      %100 = vector.shape_cast %99 : vector<1xf32> to vector<1x1x1xf32>
      %101 = vector.extract %100[0, 0, 0] : f32 from vector<1x1x1xf32>
      %c0_i32_78 = arith.constant 0 : i32
      %102 = arith.cmpi eq, %arg0, %c0_i32_78 : i32
      %103 = arith.extui %102 : i1 to i32
      %104 = arith.sitofp %103 : i32 to f32
      %c0_79 = arith.constant 0 : index
      %c0_80 = arith.constant 0 : index
      %105 = vector.load %arg14[%c0_79, %c0_80] : memref<2x8xf32, #tpu.memory_space<vmem>>, vector<2x8xf32>
      %c0_81 = arith.constant 0 : index
      %c0_82 = arith.constant 0 : index
      %106 = vector.load %arg12[%c0_81, %c0_82] : memref<2x8xf32, #tpu.memory_space<vmem>>, vector<2x8xf32>
      %c0_83 = arith.constant 0 : index
      %c0_84 = arith.constant 0 : index
      %107 = vector.load %arg13[%c0_83, %c0_84] : memref<2x8xf32, #tpu.memory_space<vmem>>, vector<2x8xf32>
      %cst_85 = arith.constant 1.000000e+00 : f32
      %108 = vector.broadcast %cst_85 : f32 to vector<2x8xf32>
      %109 = arith.addf %107, %108 : vector<2x8xf32>
      %110 = math.log %109 : vector<2x8xf32>
      %111 = arith.subf %106, %110 : vector<2x8xf32>
      %112 = arith.mulf %111, %111 : vector<2x8xf32>
      %113 = arith.mulf %112, %105 : vector<2x8xf32>
      %114 = vector.shape_cast %113 : vector<2x8xf32> to vector<1x2x8xf32>
      %cst_86 = arith.constant dense<0.000000e+00> : vector<1xf32>
      %115 = vector.multi_reduction <add>, %114, %cst_86 [1, 2] : vector<1x2x8xf32> to vector<1xf32>
      %116 = vector.shape_cast %115 : vector<1xf32> to vector<1x1x1xf32>
      %117 = vector.extract %116[0, 0, 0] : f32 from vector<1x1x1xf32>
      %118 = arith.mulf %104, %117 : f32
      %119 = vector.shape_cast %105 : vector<2x8xf32> to vector<1x2x8xf32>
      %cst_87 = arith.constant dense<0.000000e+00> : vector<1xf32>
      %120 = vector.multi_reduction <add>, %119, %cst_87 [1, 2] : vector<1x2x8xf32> to vector<1xf32>
      %121 = vector.shape_cast %120 : vector<1xf32> to vector<1x1x1xf32>
      %122 = vector.extract %121[0, 0, 0] : f32 from vector<1x1x1xf32>
      %123 = arith.mulf %104, %122 : f32
      %124 = tpu.iota {dimensions = array<i32: 2>} : vector<1x1x16xi32>
      %cst_88 = arith.constant 0.000000e+00 : f32
      %125 = vector.broadcast %cst_88 : f32 to vector<1x1x16xf32>
      %c0_i32_89 = arith.constant 0 : i32
      %126 = vector.broadcast %c0_i32_89 : i32 to vector<1x1x16xi32>
      %127 = arith.cmpi eq, %124, %126 : vector<1x1x16xi32>
      %128 = vector.broadcast %71 : f32 to vector<1x1x16xf32>
      %129 = arith.select %127, %128, %125 : vector<1x1x16xi1>, vector<1x1x16xf32>
      %c1_i32 = arith.constant 1 : i32
      %130 = vector.broadcast %c1_i32 : i32 to vector<1x1x16xi32>
      %131 = arith.cmpi eq, %124, %130 : vector<1x1x16xi32>
      %132 = vector.broadcast %76 : f32 to vector<1x1x16xf32>
      %133 = arith.select %131, %132, %129 : vector<1x1x16xi1>, vector<1x1x16xf32>
      %c2_i32 = arith.constant 2 : i32
      %134 = vector.broadcast %c2_i32 : i32 to vector<1x1x16xi32>
      %135 = arith.cmpi eq, %124, %134 : vector<1x1x16xi32>
      %136 = vector.broadcast %81 : f32 to vector<1x1x16xf32>
      %137 = arith.select %135, %136, %133 : vector<1x1x16xi1>, vector<1x1x16xf32>
      %c3_i32 = arith.constant 3 : i32
      %138 = vector.broadcast %c3_i32 : i32 to vector<1x1x16xi32>
      %139 = arith.cmpi eq, %124, %138 : vector<1x1x16xi32>
      %140 = vector.broadcast %86 : f32 to vector<1x1x16xf32>
      %141 = arith.select %139, %140, %137 : vector<1x1x16xi1>, vector<1x1x16xf32>
      %c4_i32 = arith.constant 4 : i32
      %142 = vector.broadcast %c4_i32 : i32 to vector<1x1x16xi32>
      %143 = arith.cmpi eq, %124, %142 : vector<1x1x16xi32>
      %144 = vector.broadcast %91 : f32 to vector<1x1x16xf32>
      %145 = arith.select %143, %144, %141 : vector<1x1x16xi1>, vector<1x1x16xf32>
      %c5_i32 = arith.constant 5 : i32
      %146 = vector.broadcast %c5_i32 : i32 to vector<1x1x16xi32>
      %147 = arith.cmpi eq, %124, %146 : vector<1x1x16xi32>
      %148 = vector.broadcast %96 : f32 to vector<1x1x16xf32>
      %149 = arith.select %147, %148, %145 : vector<1x1x16xi1>, vector<1x1x16xf32>
      %c6_i32 = arith.constant 6 : i32
      %150 = vector.broadcast %c6_i32 : i32 to vector<1x1x16xi32>
      %151 = arith.cmpi eq, %124, %150 : vector<1x1x16xi32>
      %152 = vector.broadcast %101 : f32 to vector<1x1x16xf32>
      %153 = arith.select %151, %152, %149 : vector<1x1x16xi1>, vector<1x1x16xf32>
      %c7_i32 = arith.constant 7 : i32
      %154 = vector.broadcast %c7_i32 : i32 to vector<1x1x16xi32>
      %155 = arith.cmpi eq, %124, %154 : vector<1x1x16xi32>
      %156 = vector.broadcast %118 : f32 to vector<1x1x16xf32>
      %157 = arith.select %155, %156, %153 : vector<1x1x16xi1>, vector<1x1x16xf32>
      %c8_i32 = arith.constant 8 : i32
      %158 = vector.broadcast %c8_i32 : i32 to vector<1x1x16xi32>
      %159 = arith.cmpi eq, %124, %158 : vector<1x1x16xi32>
      %160 = vector.broadcast %123 : f32 to vector<1x1x16xf32>
      %161 = arith.select %159, %160, %157 : vector<1x1x16xi1>, vector<1x1x16xf32>
      %c0_90 = arith.constant 0 : index
      %c0_91 = arith.constant 0 : index
      %c0_92 = arith.constant 0 : index
      %162 = vector.load %arg15[%c0_90, %c0_91, %c0_92] : memref<1x1x16xf32, #tpu.memory_space<vmem>>, vector<1x1x16xf32>
      tpu.vector_store %arg15[%c0_90, %c0_91, %c0_92], %161 {strides = array<i32>} : memref<1x1x16xf32, #tpu.memory_space<vmem>>, vector<1x1x16xf32>,
    } else {
    }
    return
  }
  func.func @transform_0(%arg0: i32, %arg1: i32) -> (i32, i32, i32) {
    %c1_i32 = arith.constant 1 : i32
    %0 = arith.muli %arg0, %c1_i32 : i32
    %1 = arith.addi %0, %arg1 : i32
    %c0_i32 = arith.constant 0 : i32
    %c0_i32_0 = arith.constant 0 : i32
    %c0_i32_1 = arith.constant 0 : i32
    return %c0_i32, %1, %c0_i32_0 : i32, i32, i32
  }
  func.func @transform_1(%arg0: i32, %arg1: i32) -> (i32, i32, i32) {
    %c1_i32 = arith.constant 1 : i32
    %0 = arith.muli %arg0, %c1_i32 : i32
    %1 = arith.addi %0, %arg1 : i32
    %c0_i32 = arith.constant 0 : i32
    %c0_i32_0 = arith.constant 0 : i32
    %c0_i32_1 = arith.constant 0 : i32
    return %c0_i32, %1, %c0_i32_0 : i32, i32, i32
  }
  func.func @transform_2(%arg0: i32, %arg1: i32) -> (i32, i32, i32) {
    %c1_i32 = arith.constant 1 : i32
    %0 = arith.muli %arg0, %c1_i32 : i32
    %1 = arith.addi %0, %arg1 : i32
    %c0_i32 = arith.constant 0 : i32
    %c0_i32_0 = arith.constant 0 : i32
    %c0_i32_1 = arith.constant 0 : i32
    return %c0_i32, %1, %c0_i32_0 : i32, i32, i32
  }
  func.func @transform_3(%arg0: i32, %arg1: i32) -> (i32, i32) {
    %c1_i32 = arith.constant 1 : i32
    %0 = arith.muli %arg0, %c1_i32 : i32
    %1 = arith.addi %0, %arg1 : i32
    %c0_i32 = arith.constant 0 : i32
    %c0_i32_0 = arith.constant 0 : i32
    return %c0_i32, %1 : i32, i32
  }
  func.func @transform_4(%arg0: i32, %arg1: i32) -> (i32, i32) {
    %c1_i32 = arith.constant 1 : i32
    %0 = arith.muli %arg0, %c1_i32 : i32
    %1 = arith.addi %0, %arg1 : i32
    %c0_i32 = arith.constant 0 : i32
    %c0_i32_0 = arith.constant 0 : i32
    return %c0_i32, %1 : i32, i32
  }
  func.func @transform_5(%arg0: i32, %arg1: i32) -> (i32, i32) {
    %c1_i32 = arith.constant 1 : i32
    %0 = arith.muli %arg0, %c1_i32 : i32
    %1 = arith.addi %0, %arg1 : i32
    %c0_i32 = arith.constant 0 : i32
    %c0_i32_0 = arith.constant 0 : i32
    return %c0_i32, %1 : i32, i32
  }
  func.func @transform_6(%arg0: i32, %arg1: i32) -> (i32, i32) {
    %c1_i32 = arith.constant 1 : i32
    %0 = arith.muli %arg0, %c1_i32 : i32
    %1 = arith.addi %0, %arg1 : i32
    %c0_i32 = arith.constant 0 : i32
    %c0_i32_0 = arith.constant 0 : i32
    return %c0_i32, %1 : i32, i32
  }
  func.func @transform_7(%arg0: i32, %arg1: i32) -> (i32, i32) {
    %c1_i32 = arith.constant 1 : i32
    %0 = arith.muli %arg0, %c1_i32 : i32
    %1 = arith.addi %0, %arg1 : i32
    %c0_i32 = arith.constant 0 : i32
    %c0_i32_0 = arith.constant 0 : i32
    return %c0_i32, %1 : i32, i32
  }
  func.func @transform_8(%arg0: i32, %arg1: i32) -> (i32, i32) {
    %c1_i32 = arith.constant 1 : i32
    %0 = arith.muli %arg0, %c1_i32 : i32
    %1 = arith.addi %0, %arg1 : i32
    %c0_i32 = arith.constant 0 : i32
    %c0_i32_0 = arith.constant 0 : i32
    return %c0_i32, %1 : i32, i32
  }
  func.func @transform_9(%arg0: i32, %arg1: i32) -> (i32, i32) {
    %c1_i32 = arith.constant 1 : i32
    %0 = arith.muli %arg0, %c1_i32 : i32
    %1 = arith.addi %0, %arg1 : i32
    %c0_i32 = arith.constant 0 : i32
    %c0_i32_0 = arith.constant 0 : i32
    return %c0_i32, %1 : i32, i32
  }
  func.func @transform_10(%arg0: i32, %arg1: i32) -> (i32, i32) {
    %c0_i32 = arith.constant 0 : i32
    %c0_i32_0 = arith.constant 0 : i32
    %c0_i32_1 = arith.constant 0 : i32
    return %c0_i32, %c0_i32_0 : i32, i32
  }
  func.func @transform_11(%arg0: i32, %arg1: i32) -> (i32, i32) {
    %c0_i32 = arith.constant 0 : i32
    %c0_i32_0 = arith.constant 0 : i32
    %c0_i32_1 = arith.constant 0 : i32
    return %c0_i32, %c0_i32_0 : i32, i32
  }
  func.func @transform_12(%arg0: i32, %arg1: i32) -> (i32, i32) {
    %c0_i32 = arith.constant 0 : i32
    %c0_i32_0 = arith.constant 0 : i32
    %c0_i32_1 = arith.constant 0 : i32
    return %c0_i32, %c0_i32_0 : i32, i32
  }
  func.func @transform_13(%arg0: i32, %arg1: i32) -> (i32, i32, i32) {
    %c0_i32 = arith.constant 0 : i32
    %c0_i32_0 = arith.constant 0 : i32
    %c0_i32_1 = arith.constant 0 : i32
    return %arg0, %c0_i32, %c0_i32_0 : i32, i32, i32
  }
}

</mosaic_0001>

<bundles_post_ra>
// kernel: tpu_custom_call.1
= control target key start
LH: loop header
LB: loop body
LE: loop exit
PB: predicated region body
PF: predicated region fallthrough
CT: control target
= control target key end

     0   :  { %18 = vsyncpa [#allocation11], 0  ;;  %s940_s25 = smov 0   ;;  %s1174_s0 = inlined_call_operand.vmem [shape: f32[2,16,8], index: 0, kind: input, shape index: {}]   ;;  %s1175_s1 = inlined_call_operand.vmem [shape: f32[2,16,8], index: 1, kind: input, shape index: {}]   ;;  %s1176_s2 = inlined_call_operand.vmem [shape: f32[2,20,8], index: 2, kind: input, shape index: {}]   ;;  %s1177_s3 = inlined_call_operand.vmem [shape: f32[2,16], index: 3, kind: input, shape index: {}]   ;;  %s1178_s4 = inlined_call_operand.vmem [shape: f32[2,16], index: 4, kind: input, shape index: {}]   ;;  %s1179_s5 = inlined_call_operand.vmem [shape: f32[2,16], index: 5, kind: input, shape index: {}]   ;;  %s1180_s6 = inlined_call_operand.vmem [shape: f32[2,16], index: 6, kind: input, shape index: {}]   ;;  %s1181_s7 = inlined_call_operand.vmem [shape: f32[2,16], index: 7, kind: input, shape index: {}]   ;;  %s1182_s8 = inlined_call_operand.vmem [shape: f32[2,16], index: 8, kind: input, shape index: {}]   ;;  %s1183_s9 = inlined_call_operand.vmem [shape: f32[2,16], index: 9, kind: input, shape index: {}]   ;;  %s1184_s10 = inlined_call_operand.vmem [shape: f32[2,8], index: 10, kind: input, shape index: {}]   ;;  %s1185_s11 = inlined_call_operand.vmem [shape: f32[2,8], index: 11, kind: input, shape index: {}]   ;;  %s1186_s12 = inlined_call_operand.vmem [shape: f32[2,8], index: 12, kind: input, shape index: {}]   ;;  %s1187_s13 = inlined_call_operand.hbm [shape: f32[1,1,16], index: 13, kind: output, shape index: {}]  }
   0x1 LB: > { %v123_v0 = vld [vmem:[%s1176_s2] sm:$0xff]  ;;  %v125_v1 = vld [vmem:[%s1176_s2 + $0x8] sm:$0xff]  ;;  %v127_v2 = vld [vmem:[%s1176_s2 + $0x18] sm:$0xff]  ;;  %s117_s25 = sadd.s32 1, %s942_s25   ;;  %s942_s25 = sphi %s940_s25, %s117_s25  }
   0x2   : > { %124 = vst [vmem:[#allocation9] sm:$0xff] %v123_v0  ;;  %v129_v3 = vld [vmem:[%s1176_s2 + $0x20] sm:$0xff]  ;;  %p116_p0 = scmp.ge.s32.totalorder %s117_s25, 1 }
   0x3   : > { %126 = vst [vmem:[#allocation9 + $0x8] sm:$0xff] %v125_v1  ;;  %v388_v4 = vlaneseq (%p116_p0)  ;;  %v363_v6 = vld [vmem:[%s1174_s0 + $0x10] sm:$0xff] (%p116_p0)  ;;  %v361_v9 = vld [vmem:[%s1174_s0] sm:$0xff] (%p116_p0)  ;;  %vm373_vm0 = vcmask (%p116_p0), 64512   ;;  %vm347_vm1 = vcmask (%p116_p0), 123904   ;;  %v364_v18 = vld [vmem:[%s1174_s0 + $0x18] sm:$0xff] (%p116_p0) }
   0x4   : > { %128 = vst [vmem:[#allocation9 + $0x10] sm:$0xff] %v127_v2  ;;  %119 = sbr.rel (!%p116_p0) target bundleno = 1 (0x1), region = 172  ;;  %v1043_v10 = vld [vmem:[%s1178_s4] sm:$0x3] (%p116_p0)  ;;  %v944_v30 = vmov (%p116_p0), 0.0   ;;  %v362_v38 = vld [vmem:[%s1174_s0 + $0x8] sm:$0xff] (%p116_p0) }
   0x5   : > { %130 = vst [vmem:[#allocation9 + $0x18] sm:$0xff] %v129_v3  ;;  %v389_v11 = vshrl.u32 (%p116_p0), %v388_v4, 7  ;;  %v1050_v13 = vld [vmem:[%s1180_s6] sm:$0x3] (%p116_p0)  ;;  %v513_v17 = vand.u32 (%p116_p0), 2147483647, %v1043_v10 }
   0x6   :  { %v1057_v16 = vld [vmem:[%s1183_s9] sm:$0x3] (%p116_p0)  ;;  %vm531_vm2 = vcmp.eq.f32.partialorder (%p116_p0), %v1050_v13, 0.0  ;;  %350 = vst.msk [vmem:[#allocation4] sm:$0x3] (%p116_p0), %vm347_vm1, %v944_v30  ;;  %v510_v59 = vmax.f32 (%p116_p0), %v1043_v10, 0.0  ;;  %v511_v60 = vmul.f32 (%p116_p0), %v1050_v13, %v1043_v10 }
   0x7   :  { %885 = vset.pattern.permute.xlu2 (%p116_p0), %v389_v11  ;;  %v535_v20 = vld [vmem:[%s1177_s3] sm:$0x3] (%p116_p0)  ;;  %886 = vset.pattern.permute.xlu0 (%p116_p0), %v389_v11  ;;  %v514_v24 = vsub.f32 (%p116_p0), 0.0, %v513_v17  ;;  %v831_v31 = vsel (%p116_p0), %vm531_vm2, 1.0, %v944_v30  ;;  %351 = vst.msk [vmem:[#allocation5] sm:$0x3] (%p116_p0), %vm347_vm1, %v944_v30 }
   0x8   :  { %v536_v25 = vld [vmem:[%s1179_s5] sm:$0x3] (%p116_p0)  ;;  %v534_v34 = vmul.f32 (%p116_p0), %v831_v31, %v1057_v16  ;;  %v387_v36 = vperm.slane (%p116_p0), %v1057_v16, 0  ;;  %352 = vst.msk [vmem:[#allocation6] sm:$0x3] (%p116_p0), %vm347_vm1, %v944_v30  ;;  %v396_v39 = vadd.s32 (%p116_p0), 8, %v389_v11  ;;  %v512_v0 = vsub.f32 (%p116_p0), %v510_v59, %v511_v60 }
   0x9   :  { %v1034_v7 = vld [vmem:[#allocation9] sm:$0xff]  ;;  %v543_v26 = vld [vmem:[%s1181_s7] sm:$0x3]  ;;  %v537_v28 = vsub.f32 %v535_v20, %v536_v25  ;;  %v515_v32 = vmul.f32 1.442695, %v514_v24  ;;  %vm442_vm4 = vcmask 130112  }
   0xa   :  { %v365_v12 = vsub.f32 %v361_v9, %v1034_v7  ;;  %v1068_v22 = vld [vmem:[#allocation9 + $0x8] sm:$0xff]  ;;  %v544_v29 = vld [vmem:[%s1182_s8] sm:$0x3]  ;;  %353 = vst.msk [vmem:[#allocation7] sm:$0x3] %vm347_vm1, %v944_v30  ;;  %888 = vset.pattern.permute.xlu1 %v396_v39  ;;  %v400_v9 = vperm.slane %v1057_v16, 1 }
   0xb   :  { %v1029_v5 = vld [vmem:[#allocation9 + $0x10] sm:$0xff]  ;;  %v545_v33 = vsub.f32 %v543_v26, %v544_v29  ;;  %v539_v37 = vmul.f32 %v537_v28, %v537_v28  ;;  %892 = vpow2.f32 %v515_v32  ;;  %v366_v41 = vsub.f32 %v362_v38, %v1068_v22  ;;  %354 = vst.msk [vmem:[#allocation8] sm:$0x3] %vm347_vm1, %v944_v30  ;;  %v456_v10 = vld [vmem:[%s1175_s1 + $0x10] sm:$0xff]  ;;  %v455_v17 = vld [vmem:[%s1175_s1 + $0x8] sm:$0xff]  ;;  %s708_s28 = sshll.u32 %s1187_s13, 4  ;;  %s709_s28 = int_to_ptr.hbm [resolvable:$true] %s708_s28 }
   0xc   :  { %v367_v8 = vsub.f32 %v363_v6, %v1029_v5  ;;  %v1052_v14 = vld [vmem:[#allocation9 + $0x18] sm:$0xff]  ;;  %v369_v19 = vand.u32 2147483647, %v365_v12  ;;  %348 = vst.msk [vmem:[#allocation2] sm:$0x3] %vm347_vm1, %v944_v30  ;;  %v460_v12 = vsub.f32 %v456_v10, %v1029_v5  ;;  %vm447_vm5 = vcmask 1041409  }
   0xd   :  { %v368_v21 = vsub.f32 %v364_v18, %v1052_v14  ;;  %v547_v40 = vmul.f32 %v545_v33, %v545_v33  ;;  %v540_v42 = vmul.f32 %v539_v37, %v534_v34  ;;  %v370_v44 = vand.u32 2147483647, %v366_v41  ;;  %349 = vst.msk [vmem:[#allocation3] sm:$0x3] %vm347_vm1, %v944_v30  ;;  %v527_v6 = vld [vmem:[#allocation4] sm:$0x3] }
   0xe   :  { %v371_v15 = vand.u32 2147483647, %v367_v8  ;;  %v374_v27 = vsel %vm373_vm0, %v369_v19, 0.0  ;;  %v538_v47 = vld [vmem:[#allocation5] sm:$0x3]  ;;  %vm649_vm6 = vcmask 58368  }
   0xf   :  { %375 = vadd.xlane.f32.xlu0 %v374_v27  ;;  %v372_v35 = vand.u32 2147483647, %v368_v21  ;;  %v548_v45 = vmul.f32 %v547_v40, %v1057_v16  ;;  %392 = vperm.xlu2 %885, %v387_v36   ;;  %v377_v46 = vsel %vm373_vm0, %v370_v44, 0.0  ;;  %v541_v49 = vadd.f32 %v540_v42, %v538_v47  ;;  %v546_v50 = vld [vmem:[#allocation6] sm:$0x3]  ;;  %v454_v20 = vld [vmem:[%s1175_s1] sm:$0xff] }
  0x10   :  { %v380_v23 = vsel %vm373_vm0, %v371_v15, 0.0  ;;  %v464_v13 = vand.u32 2147483647, %v460_v12  ;;  %v458_v21 = vsub.f32 %v454_v20, %v1034_v7  ;;  %v945_v27 = vmov 0   ;;  %s946_s30 = smov [#allocation10]  }
  0x11   :  { %381 = vadd.xlane.f32.xlu1 %v380_v23  ;;  %v383_v43 = vsel %vm373_vm0, %v372_v35, 0.0  ;;  %v893_v48 = vpop.eup %892  ;;  %v549_v53 = vadd.f32 %v548_v45, %v546_v50  ;;  %v551_v54 = vld [vmem:[#allocation7] sm:$0x3]  ;;  %542 = vst.msk [vmem:[#allocation5] sm:$0x3] %vm347_vm1, %v541_v49  ;;  %v457_v23 = vld [vmem:[%s1175_s1 + $0x18] sm:$0xff] }
  0x12   :  { %v517_v51 = vadd.f32 1.0, %v893_v48  ;;  %v520_v52 = vmul.f32 -0.5, %v893_v48  ;;  %v552_v55 = vadd.f32 %v551_v54, %v1057_v16  ;;  %v554_v56 = vld [vmem:[#allocation8] sm:$0x3]  ;;  %v523_v61 = vand.u32 2147483647, %v893_v48 }
  0x13   :  { %550 = vst.msk [vmem:[#allocation6] sm:$0x3] %vm347_vm1, %v549_v53  ;;  %v555_v57 = vadd.f32 %v554_v56, %v534_v34  ;;  %v472_v15 = vsel %vm373_vm0, %v464_v13, 0.0  ;;  %v462_v5 = vand.u32 2147483647, %v458_v21  ;;  %v461_v25 = vsub.f32 %v457_v23, %v1052_v14  ;;  %s706_s3 = sshll.u32 %s946_s30, 4  ;;  %s707_s3 = int_to_ptr.vmem [resolvable:$true] %s706_s3 }
  0x14   :  { %894 = vlog2.f32 %v517_v51  ;;  %v521_v58 = vadd.f32 1.0, %v520_v52  ;;  %553 = vst.msk [vmem:[#allocation7] sm:$0x3] %vm347_vm1, %v552_v55  ;;  %vm524_vm3 = vcmp.lt.f32.partialorder %v523_v61, 0.0004427343  ;;  %v1131_v52 = vand.u32 127, %v388_v4 }
  0x15   :  { %556 = vst.msk [vmem:[#allocation8] sm:$0x3] %vm347_vm1, %v555_v57  ;;  %v466_v24 = vsel %vm373_vm0, %v462_v5, 0.0  ;;  %v360_v60 = vld [vmem:[#allocation2] sm:$0x3] }
  0x16   :  { %v522_v62 = vmul.f32 %v893_v48, %v521_v58  ;;  %v440_v53 = vadd.s32 4294967288, %v1131_v52  ;;  %vm672_vm7 = vcmp.eq.s32.totalorder %v1131_v52, 0  ;;  %vm675_vm8 = vcmp.eq.s32.totalorder %v1131_v52, 1 }
  0x17   :  { %378 = vadd.xlane.f32.xlu0 %v377_v46  ;;  %887 = vset.pattern.permute.xlu2 %v396_v39  ;;  %vm678_vm9 = vcmp.eq.s32.totalorder %v1131_v52, 2  ;;  %vm681_vm10 = vcmp.eq.s32.totalorder %v1131_v52, 3  ;;  %vm684_vm11 = vcmp.eq.s32.totalorder %v1131_v52, 4  ;;  %vm687_vm12 = vcmp.eq.s32.totalorder %v1131_v52, 5 }
  0x18   :  { %v593_v46 = vld [vmem:[#allocation5] sm:$0x3]  ;;  %vm690_vm13 = vcmp.eq.s32.totalorder %v1131_v52, 6  ;;  %vm693_vm14 = vcmp.eq.s32.totalorder %v1131_v52, 7  ;;  %vm696_vm15 = vcmp.eq.s32.totalorder %v1131_v52, 8 }
  0x19   :  { %384 = vadd.xlane.f32.xlu1 %v383_v43  ;;  %v594_v48 = vsel %vm347_vm1, %v593_v46, 0.0 }
  0x1a   :  { %v895_v63 = vpop.eup %894 }
  0x1b   :  { %v519_v1 = vmul.f32 0.6931472, %v895_v63  ;;  %v615_v49 = vld [vmem:[#allocation7] sm:$0x3] }
  0x1c   :  { %v616_v51 = vsel %vm347_vm1, %v615_v49, 0.0 }
  0x1d   :  { %v525_v2 = vsel %vm524_vm3, %v522_v62, %v519_v1 }
  0x1e   :  { %v526_v3 = vadd.f32 %v525_v2, %v512_v0  ;;  %v604_v2 = vld [vmem:[#allocation6] sm:$0x3] }
  0x1f   :  { %398 = vperm.xlu2 %887, %v387_v36  }
  0x20   :  { %v528_v8 = vmul.f32 %v526_v3, %v1057_v16  ;;  %v459_v16 = vsub.f32 %v455_v17, %v1068_v22  ;;  %v465_v22 = vand.u32 2147483647, %v461_v25  ;;  %v605_v3 = vsel %vm347_vm1, %v604_v2, 0.0  ;;  %v641_v17 = vld [vmem:[%s1184_s10] sm:$0x3] }
  0x22   :  { %v529_v11 = vadd.f32 %v528_v8, %v527_v6  ;;  %v463_v18 = vand.u32 2147483647, %v459_v16  ;;  %v475_v26 = vsel %vm373_vm0, %v465_v22, 0.0  ;;  %v642_v6 = vld [vmem:[%s1185_s11] sm:$0x3] }
  0x23   :  { %v643_v8 = vadd.f32 1.0, %v642_v6 }
  0x24   :  { %530 = vst.msk [vmem:[#allocation4] sm:$0x3] %vm347_vm1, %v529_v11  ;;  %v469_v19 = vsel %vm373_vm0, %v463_v18, 0.0  ;;  %vm699_vm0 = vcmask 122880  }
  0x25   :  { %896 = vlog2.f32 %v643_v8 }
  0x27   :  { %889 = vset.pattern.permute.xlu2 %v945_v27 }
  0x2b   :  { %405 = vperm.xlu0 %886, %v400_v9   ;;  %v897_v10 = vpop.eup %896  ;;  %v582_v12 = vld [vmem:[#allocation4] sm:$0x3] }
  0x2c   :  { %v583_v13 = vsel %vm347_vm1, %v582_v12, 0.0 }
  0x32   :  { %411 = vperm.xlu1 %888, %v400_v9   ;;  %v626_v9 = vld [vmem:[#allocation8] sm:$0x3] }
  0x33   :  { %890 = vset.pattern.permute.xlu0 %v945_v27  ;;  %v627_v11 = vsel %vm347_vm1, %v626_v9, 0.0 }
  0x3a   :  { %891 = vset.pattern.permute.xlu1 %v945_v27 }
  0x48   :  { %467 = vadd.xlane.f32.xlu2 %v466_v24 }
  0x50   :  { %476 = vadd.xlane.f32.xlu2 %v475_v26 }
  0x55   :  { %473 = vadd.xlane.f32.xlu0 %v472_v15  ;;  %v645_v15 = vmul.f32 0.6931472, %v897_v10 }
  0x57   :  { %v646_v16 = vsub.f32 %v641_v17, %v645_v15 }
  0x59   :  { %v647_v18 = vmul.f32 %v646_v16, %v646_v16 }
  0x5c   :  { %470 = vadd.xlane.f32.xlu1 %v469_v19  ;;  %v640_v19 = vld [vmem:[%s1186_s12] sm:$0x3] }
  0x5d   :  { %v648_v20 = vmul.f32 %v647_v18, %v640_v19 }
  0x5f   :  { %v650_v21 = vsel %vm649_vm6, %v648_v20, 0.0 }
  0x69   :  { %v393_v7 = vpop.permute.xlu2 %392 }
  0x79   :  { %v399_v30 = vpop.permute.xlu2 %398 }
  0x82   :  { %v376_v28 = vpop.xlane.xlu0 %375 }
  0x83   :  { %v417_v29 = vmul.f32 %v393_v7, %v376_v28  ;;  %v453_v28 = vld [vmem:[#allocation3] sm:$0x3] }
  0x84   :  { %v382_v14 = vpop.xlane.xlu1 %381 }
  0x85   :  { %426 = vperm.xlu2 %889, %v417_v29  }
  0x8a   :  { %v379_v31 = vpop.xlane.xlu0 %378 }
  0x8b   :  { %v418_v32 = vmul.f32 %v399_v30, %v379_v31 }
  0x8c   :  { %v385_v33 = vpop.xlane.xlu1 %384 }
  0x8d   :  { %429 = vperm.xlu1 %891, %v418_v32  }
  0x9d   :  { %v406_v34 = vpop.permute.xlu0 %405 }
  0x9e   :  { %v419_v35 = vmul.f32 %v406_v34, %v382_v14 }
  0xa0   :  { %432 = vperm.xlu2 %889, %v419_v35  }
  0xa4   :  { %v412_v36 = vpop.permute.xlu1 %411 }
  0xa5   :  { %v420_v37 = vmul.f32 %v412_v36, %v385_v33 }
  0xa8   :  { %435 = vperm.xlu2 %889, %v420_v37  }
  0xbb   :  { %v468_v38 = vpop.xlane.xlu2 %467 }
  0xbc   :  { %v478_v39 = vmul.f32 %v468_v38, %v393_v7 }
  0xbe   :  { %487 = vperm.xlu0 %890, %v478_v39  }
  0xc3   :  { %v477_v44 = vpop.xlane.xlu2 %476 }
  0xc4   :  { %v481_v45 = vmul.f32 %v477_v44, %v412_v36 }
  0xc8   :  { %v474_v40 = vpop.xlane.xlu0 %473 }
  0xc9   :  { %v480_v41 = vmul.f32 %v474_v40, %v406_v34  ;;  %v661_v34 = vsel %vm649_vm6, %v640_v19, 0.0 }
  0xcb   :  { %493 = vperm.xlu1 %891, %v480_v41  }
  0xcf   :  { %v471_v42 = vpop.xlane.xlu1 %470 }
  0xd0   :  { %v479_v43 = vmul.f32 %v471_v42, %v399_v30 }
  0xd2   :  { %490 = vperm.xlu2 %889, %v479_v43  }
  0xda   :  { %496 = vperm.xlu2 %889, %v481_v45  }
  0xdf   :  { %v427_v47 = vpop.permute.xlu2 %426 }
  0xe0   :  { %v439_v57 = vperm.slane %v427_v47, %v1131_v52 }
  0xe8   :  { %584 = vadd.xlane.f32.xlu0 %v583_v13 }
  0xf5   :  { %595 = vadd.xlane.f32.xlu1 %v594_v48 }
  0xfa   :  { %v433_v50 = vpop.permute.xlu2 %432 }
  0xfb   :  { %v444_v58 = vperm.slane %v433_v50, %v1131_v52 }
  0xfd   :  { %617 = vadd.xlane.f32.xlu1 %v616_v51 }
  0xff   :  { %v430_v54 = vpop.permute.xlu1 %429 }
 0x100   :  { %v441_v55 = vperm.slane %v430_v54, %v440_v53 }
 0x102   :  { %v436_v56 = vpop.permute.xlu2 %435  ;;  %v443_v61 = vsel %vm442_vm4, %v441_v55, %v439_v57 }
 0x103   :  { %v445_v59 = vperm.slane %v436_v56, %v440_v53  ;;  %606 = vadd.xlane.f32.xlu2 %v605_v3 }
 0x105   :  { %v446_v62 = vsel %vm442_vm4, %v445_v59, %v444_v58 }
 0x106   :  { %v448_v4 = vsel %vm447_vm5, %v446_v62, %v443_v61 }
 0x107   :  { %v450_v63 = vadd.f32 %v448_v4, %v360_v60 }
 0x109   :  { %452 = vst.msk [vmem:[#allocation2] sm:$0x3] %vm347_vm1, %v450_v63 }
 0x10b   :  { %628 = vadd.xlane.f32.xlu2 %v627_v11 }
 0x110   :  { %v560_v0 = vld [vmem:[#allocation2] sm:$0x3] }
 0x111   :  { %v561_v1 = vsel %vm347_vm1, %v560_v0, 0.0 }
 0x112   :  { %562 = vadd.xlane.f32.xlu1 %v561_v1 }
 0x11a   :  { %651 = vadd.xlane.f32.xlu1 %v650_v21 }
 0x12c   :  { %v491_v5 = vpop.permute.xlu2 %490 }
 0x12d   :  { %v499_v26 = vperm.slane %v491_v5, %v440_v53 }
 0x130   :  { %v488_v23 = vpop.permute.xlu0 %487 }
 0x131   :  { %v498_v25 = vperm.slane %v488_v23, %v1131_v52 }
 0x133   :  { %v500_v29 = vsel %vm442_vm4, %v499_v26, %v498_v25 }
 0x134   :  { %v497_v24 = vpop.permute.xlu2 %496 }
 0x135   :  { %v502_v27 = vperm.slane %v497_v24, %v440_v53 }
 0x13d   :  { %v494_v22 = vpop.permute.xlu1 %493 }
 0x13e   :  { %v501_v7 = vperm.slane %v494_v22, %v1131_v52 }
 0x140   :  { %v503_v30 = vsel %vm442_vm4, %v502_v27, %v501_v7 }
 0x141   :  { %v504_v31 = vsel %vm447_vm5, %v503_v30, %v500_v29 }
 0x142   :  { %v506_v32 = vadd.f32 %v504_v31, %v453_v28 }
 0x144   :  { %507 = vst.msk [vmem:[#allocation3] sm:$0x3] %vm347_vm1, %v506_v32 }
 0x14b   :  { %v571_v14 = vld [vmem:[#allocation3] sm:$0x3] }
 0x14c   :  { %v572_v33 = vsel %vm347_vm1, %v571_v14, 0.0 }
 0x14d   :  { %573 = vadd.xlane.f32.xlu2 %v572_v33 }
 0x155   :  { %662 = vadd.xlane.f32.xlu2 %v661_v34 }
 0x15b   :  { %v585_v45 = vpop.xlane.xlu0 %584 }
 0x15c   :  { %v586_v47 = vrot.slane %v585_v45, 4 }
 0x15e   :  { %v587_v55 = vadd.f32 %v586_v47, %v585_v45 }
 0x160   :  { %v588_v61 = vrot.slane %v587_v55, 2 }
 0x162   :  { %v589_v8 = vadd.f32 %v588_v61, %v587_v55 }
 0x164   :  { %v590_v16 = vrot.slane %v589_v8, 1 }
 0x166   :  { %v591_v26 = vadd.f32 %v590_v16, %v589_v8 }
 0x168   :  { %v596_v35 = vpop.xlane.xlu1 %595 }
 0x169   :  { %v597_v49 = vrot.slane %v596_v35, 4 }
 0x16b   :  { %v598_v56 = vadd.f32 %v597_v49, %v596_v35 }
 0x16d   :  { %v599_v4 = vrot.slane %v598_v56, 2 }
 0x16f   :  { %v600_v11 = vadd.f32 %v599_v4, %v598_v56 }
 0x170   :  { %v618_v36 = vpop.xlane.xlu1 %617 }
 0x171   :  { %v619_v51 = vrot.slane %v618_v36, 4  ;;  %v601_v21 = vrot.slane %v600_v11, 1 }
 0x173   :  { %v620_v58 = vadd.f32 %v619_v51, %v618_v36  ;;  %v602_v28 = vadd.f32 %v601_v21, %v600_v11 }
 0x175   :  { %v621_v1 = vrot.slane %v620_v58, 2 }
 0x176   :  { %v607_v44 = vpop.xlane.xlu2 %606 }
 0x177   :  { %v608_v50 = vrot.slane %v607_v44, 4  ;;  %v622_v15 = vadd.f32 %v621_v1, %v620_v58 }
 0x179   :  { %v609_v57 = vadd.f32 %v608_v50, %v607_v44  ;;  %v623_v25 = vrot.slane %v622_v15, 1 }
 0x17b   :  { %v610_v0 = vrot.slane %v609_v57, 2  ;;  %v624_v31 = vadd.f32 %v623_v25, %v622_v15 }
 0x17d   :  { %v611_v10 = vadd.f32 %v610_v0, %v609_v57 }
 0x17e   :  { %v629_v46 = vpop.xlane.xlu2 %628 }
 0x17f   :  { %v630_v54 = vrot.slane %v629_v46, 4  ;;  %v612_v5 = vrot.slane %v611_v10, 1 }
 0x181   :  { %v631_v60 = vadd.f32 %v630_v54, %v629_v46  ;;  %v613_v29 = vadd.f32 %v612_v5, %v611_v10 }
 0x183   :  { %v632_v6 = vrot.slane %v631_v60, 2 }
 0x185   :  { %v563_v37 = vpop.xlane.xlu1 %562  ;;  %v633_v18 = vadd.f32 %v632_v6, %v631_v60 }
 0x186   :  { %v564_v38 = vrot.slane %v563_v37, 4 }
 0x187   :  { %v634_v27 = vrot.slane %v633_v18, 1 }
 0x188   :  { %v565_v39 = vadd.f32 %v564_v38, %v563_v37 }
 0x189   :  { %v635_v14 = vadd.f32 %v634_v27, %v633_v18 }
 0x18a   :  { %v566_v40 = vrot.slane %v565_v39, 2 }
 0x18c   :  { %v567_v41 = vadd.f32 %v566_v40, %v565_v39 }
 0x18d   :  { %v652_v48 = vpop.xlane.xlu1 %651 }
 0x18e   :  { %v568_v42 = vrot.slane %v567_v41, 1  ;;  %v653_v53 = vrot.slane %v652_v48, 4 }
 0x190   :  { %v569_v43 = vadd.f32 %v568_v42, %v567_v41  ;;  %v654_v59 = vadd.f32 %v653_v53, %v652_v48 }
 0x192   :  { %832 = vpush %v569_v43  ;;  %v655_v3 = vrot.slane %v654_v59, 2 }
 0x194   :  { %v656_v12 = vadd.f32 %v655_v3, %v654_v59 }
 0x196   :  { %v657_v22 = vrot.slane %v656_v12, 1 }
 0x198   :  { %v658_v32 = vadd.f32 %v657_v22, %v656_v12 }
 0x1c0   :  { %v574_v62 = vpop.xlane.xlu2 %573 }
 0x1c1   :  { %v575_v63 = vrot.slane %v574_v62, 4 }
 0x1c3   :  { %v576_v2 = vadd.f32 %v575_v63, %v574_v62  ;;  %s833_s10 = spop %832 }
 0x1c4   :  { %v673_v35 = vstv %s833_s10 }
 0x1c5   :  { %v577_v9 = vrot.slane %v576_v2, 2  ;;  %v674_v36 = vsel %vm672_vm7, %v673_v35, 0.0 }
 0x1c7   :  { %v578_v13 = vadd.f32 %v577_v9, %v576_v2 }
 0x1c8   :  { %v663_v17 = vpop.xlane.xlu2 %662 }
 0x1c9   :  { %v664_v19 = vrot.slane %v663_v17, 4  ;;  %v579_v20 = vrot.slane %v578_v13, 1 }
 0x1cb   :  { %v665_v23 = vadd.f32 %v664_v19, %v663_v17  ;;  %v580_v24 = vadd.f32 %v579_v20, %v578_v13 }
 0x1cd   :  { %v666_v7 = vrot.slane %v665_v23, 2  ;;  %834 = vpush %v580_v24 }
 0x1ce   :  { %836 = vpush %v591_v26 }
 0x1cf   :  { %v667_v30 = vadd.f32 %v666_v7, %v665_v23  ;;  %838 = vpush %v602_v28 }
 0x1d0   :  { %840 = vpush %v613_v29 }
 0x1d1   :  { %842 = vpush %v624_v31  ;;  %v668_v33 = vrot.slane %v667_v30, 1 }
 0x1d2   :  { %844 = vpush %v635_v14 }
 0x1d3   :  { %846 = vpush %v658_v32  ;;  %v669_v34 = vadd.f32 %v668_v33, %v667_v30 }
 0x1d5   :  { %848 = vpush %v669_v34 }
 0x1fe   :  { %s835_s12 = spop %834 }
 0x1ff   :  { %v676_v37 = vstv %s835_s12  ;;  %s837_s24 = spop %836 }
 0x200   :  { %v677_v38 = vsel %vm675_vm8, %v676_v37, %v674_v36  ;;  %v679_v39 = vstv %s837_s24  ;;  %s839_s25 = spop %838 }
 0x201   :  { %v680_v40 = vsel %vm678_vm9, %v679_v39, %v677_v38  ;;  %v682_v41 = vstv %s839_s25  ;;  %s841_s4 = spop %840 }
 0x202   :  { %v683_v42 = vsel %vm681_vm10, %v682_v41, %v680_v40  ;;  %v685_v43 = vstv %s841_s4  ;;  %s843_s26 = spop %842 }
 0x203   :  { %v686_v44 = vsel %vm684_vm11, %v685_v43, %v683_v42  ;;  %v688_v45 = vstv %s843_s26  ;;  %s845_s6 = spop %844 }
 0x204   :  { %v689_v46 = vsel %vm687_vm12, %v688_v45, %v686_v44  ;;  %v691_v47 = vstv %s845_s6  ;;  %s847_s29 = spop %846 }
 0x205   :  { %v692_v48 = vsel %vm690_vm13, %v691_v47, %v689_v46  ;;  %v694_v49 = vstv %s847_s29 }
 0x206   :  { %v695_v50 = vsel %vm693_vm14, %v694_v49, %v692_v48  ;;  %s849_s14 = spop %848 }
 0x207   :  { %v697_v51 = vstv %s849_s14 }
 0x208   :  { %v698_v53 = vsel %vm696_vm15, %v697_v51, %v695_v50 }
 0x209   :  { %700 = vst.msk [vmem:[#allocation10] sm:$0x1] %vm699_vm0, %v698_v53 }
 0x20a   :  { %711 = dma.vmem_to_hbm [thread:$0]  %s707_s3, 16, %s709_s28, [#allocation11]  }
 0x20b   :  { %938 = dma.done.wait [#allocation11], 16  }
 0x20c   :  { %939 = vsyncadd [#allocation11], 4294967280 }
 0x20d   :  { %716 = vsyncpa [#allocation11], 1 }

</bundles_post_ra>
